<compile_context>
chip_gen: v5e
topology: v5e:2x2
jax: 0.10.0
libtpu: 0.0.40
codegen_flags: <defaults>
</compile_context>

<pallas_src>
import jax
import jax.numpy as jnp
from jax.experimental import pallas as pl
from jax.experimental.pallas import tpu as pltpu


# --------------------------------------------------------------------------
# Kernels
# --------------------------------------------------------------------------
def discrim_kernel(x_ref, w_ref, b_ref, o_ref, acc_ref):
    # x_ref: (tB, tS, D) VMEM   w_ref: (1, D) VMEM   b_ref: (1, 1) SMEM
    # o_ref: (1, tB)  VMEM      acc_ref: (tB, D) VMEM scratch (f32 or bf16)
    k = pl.program_id(1)

    @pl.when(k == 0)
    def _init():
        acc_ref[...] = jnp.full(acc_ref.shape, -jnp.inf, acc_ref.dtype)

    # Running max over the sequence (dim=1) for this S tile.  No upcast when
    # the accumulator dtype matches the input (bf16 max is exact).
    x = x_ref[...]
    if x.dtype != acc_ref.dtype:
        x = x.astype(acc_ref.dtype)
    acc_ref[...] = jnp.maximum(acc_ref[...], jnp.max(x, axis=1))

    @pl.when(k == pl.num_programs(1) - 1)
    def _finalize():
        pooled = acc_ref[...].astype(jnp.float32)          # (tB, D)
        w = w_ref[...].astype(jnp.float32)                 # (1, D)
        # Linear(256, 1): VPU multiply + lane reduce (avoid N=1 MXU matmul).
        out = jnp.sum(pooled * w, axis=-1) + b_ref[0, 0]   # (tB,)
        o_ref[...] = out[None, :].astype(o_ref.dtype)      # lane-dense (1, tB)


def _partial_pool_kernel(x_ref, o_ref, acc_ref):
    # Used only on dual-TensorCore chips when B yields a single parallel tile:
    # each of the two parallel chunks pools its half of S into o_ref[c].
    k = pl.program_id(1)

    @pl.when(k == 0)
    def _init():
        acc_ref[...] = jnp.full(acc_ref.shape, -jnp.inf, acc_ref.dtype)

    x = x_ref[...]
    if x.dtype != acc_ref.dtype:
        x = x.astype(acc_ref.dtype)
    acc_ref[...] = jnp.maximum(acc_ref[...], jnp.max(x, axis=1))

    @pl.when(k == pl.num_programs(1) - 1)
    def _finalize():
        o_ref[...] = acc_ref[...][None].astype(o_ref.dtype)   # (1, tB, D)


# --------------------------------------------------------------------------
# Host-side helpers
# --------------------------------------------------------------------------
def _cdiv(a, b):
    return -(-a // b)


def _round_up(x, m):
    return _cdiv(x, m) * m


def _vmem_capacity_bytes():
    try:
        return int(pltpu.get_tpu_info().vmem_capacity_bytes)
    except Exception:
        return 64 << 20   # conservative: v7x per-TensorCore VMEM


def _num_tensorcores():
    try:
        kind = jax.devices()[0].device_kind.lower()
    except Exception:
        return 1
    return 2 if ("v7" in kind or "7x" in kind) else 1


def _acc_dtype(x_dtype):
    """bf16 max is exact -> keep the accumulator in bf16 (halves VMEM->vreg
    traffic), except on v5e whose VPU has no native bf16 path."""
    if jnp.dtype(x_dtype) != jnp.dtype(jnp.bfloat16):
        return jnp.float32
    try:
        kind = jax.devices()[0].device_kind.lower()
    except Exception:
        kind = ""
    if "v5" in kind:
        return jnp.float32
    return jnp.bfloat16


def _pick_tiles(B, S, D, itemsize, target_block_bytes):
    """Return (tB, tS, pad_B, pad_S) with tB | pad_B and tS | pad_S and the
    (8,128)/packing layout rules obeyed for the (tS, D) minor dims."""
    # Sublane packing granularity of the minor dims of the x block.
    if itemsize >= 4:
        s_align = 8
    elif itemsize == 2:
        s_align = 16      # bf16 packs two rows per sublane -> (16, 128) tile
    else:
        s_align = 32      # int8 / fp8

    # --- B tile ------------------------------------------------------------
    pad_B = B
    if B % 128 == 0 and B >= 256:
        # Longer contiguous DMA runs (tS grows under the same byte budget) and
        # >= 2 tiles on the parallel axis for dual-TC chips.
        tB = 128
    elif B <= 1024:
        tB = B            # single B tile; output block == full dim is legal
    else:
        # Large, awkward B: pad to a multiple of 128 so one block can never
        # blow past the VMEM budget; padded rows are sliced off the output.
        pad_B = _round_up(B, 128)
        tB = 128

    # --- S tile ------------------------------------------------------------
    row_bytes = tB * D * itemsize
    max_ts = max(s_align, (target_block_bytes // row_bytes) // s_align * s_align)
    if S <= max_ts:
        tS, pad_S = S, S
    else:
        # Prefer an s_align-multiple divisor of S close to the byte target.
        tS = 0
        cand = max_ts
        floor = max(s_align, max_ts // 2)
        while cand >= floor:
            if S % cand == 0:
                tS = cand
                break
            cand -= s_align
        if tS:
            pad_S = S
        else:
            # No good divisor: split S into ~equal aligned chunks and pad the
            # tail with -inf (cheap, keeps blocks at the target size).
            n_chunks = _cdiv(S, max_ts)
            tS = _round_up(_cdiv(S, n_chunks), s_align)
            pad_S = _round_up(S, tS)
    return tB, tS, pad_B, pad_S


# --------------------------------------------------------------------------
# Forward wrapper
# --------------------------------------------------------------------------
def discrim_forward(x, w, b, *, target_block_bytes=16 << 20):
    """x: (B, S, 256) f32/bf16, w: (1, 256) [PyTorch Linear layout], b: (1, 1).

    Returns (B,) float32, matching `Discrim.forward(x)`.
    """
    B, S, D = x.shape
    assert w.shape == (1, D), w.shape
    assert b.shape == (1, 1), b.shape

    itemsize = jnp.dtype(x.dtype).itemsize
    acc_dtype = _acc_dtype(x.dtype)
    cap = _vmem_capacity_bytes()

    # Keep 2 x-blocks + scratch + headroom strictly inside physical VMEM
    # (v7x: 64 MiB per TC); v5e/v6e (128 MiB) effectively keep the 16 MiB ask.
    target_block_bytes = min(target_block_bytes,
                             max(4 << 20, (cap - (12 << 20)) // 2))

    tB, tS, pad_B, pad_S = _pick_tiles(B, S, D, itemsize, target_block_bytes)

    if pad_S != S:
        # Pad the sequence with -inf so it can never win the max.
        x = jnp.pad(x, ((0, 0), (0, pad_S - S), (0, 0)),
                    constant_values=-jnp.inf)
    if pad_B != B:
        x = jnp.pad(x, ((0, pad_B - B), (0, 0), (0, 0)))

    b_tiles = pad_B // tB
    s_tiles = pad_S // tS

    x_block_bytes = tB * tS * D * itemsize
    acc_bytes = tB * D * jnp.dtype(acc_dtype).itemsize
    # 2 pipeline buffers for the x tile + running-max scratch + headroom,
    # capped below physical VMEM for Mosaic internals.
    vmem_limit = int(min(max(2 * x_block_bytes + acc_bytes + (4 << 20),
                             16 << 20),
                         cap - (8 << 20)))

    # ---- dual-TC chips, single B tile: split S across the parallel axis ----
    if (_num_tensorcores() >= 2 and b_tiles == 1
            and s_tiles >= 4 and s_tiles % 2 == 0):
        half = s_tiles // 2
        partials = pl.pallas_call(
            _partial_pool_kernel,
            out_shape=jax.ShapeDtypeStruct((2, pad_B, D), jnp.float32),
            grid_spec=pltpu.PrefetchScalarGridSpec(
                num_scalar_prefetch=0,
                grid=(2, half),
                in_specs=[pl.BlockSpec((tB, tS, D),
                                       lambda c, k: (0, c * half + k, 0))],
                out_specs=pl.BlockSpec((1, tB, D), lambda c, k: (c, 0, 0)),
                scratch_shapes=[pltpu.VMEM((tB, D), acc_dtype)],
            ),
            compiler_params=pltpu.CompilerParams(
                dimension_semantics=("parallel", "arbitrary"),
                vmem_limit_bytes=vmem_limit,
            ),
        )(x)
        pooled = jnp.max(partials[:, :B, :], axis=0)           # (B, D) f32
        # Tiny epilogue: Linear(256, 1) on the pooled features.
        return jnp.sum(pooled * w[0].astype(jnp.float32)[None, :],
                       axis=-1) + b[0, 0]

    # ---- standard path -----------------------------------------------------
    cost = pl.CostEstimate(
        flops=int(pad_B * pad_S * D + 2 * B * D),        # max compares + dot
        transcendentals=0,
        bytes_accessed=int(pad_B * pad_S * D * itemsize + D * 4 + B * 4),
    )

    out = pl.pallas_call(
        discrim_kernel,
        out_shape=jax.ShapeDtypeStruct((1, pad_B), jnp.float32),
        grid_spec=pltpu.PrefetchScalarGridSpec(
            num_scalar_prefetch=0,
            grid=(b_tiles, s_tiles),
            in_specs=[
                pl.BlockSpec((tB, tS, D), lambda i, k: (i, k, 0)),
                pl.BlockSpec((1, D), lambda i, k: (0, 0)),
                pl.BlockSpec(memory_space=pltpu.MemorySpace.SMEM),
            ],
            out_specs=pl.BlockSpec((1, tB), lambda i, k: (0, i)),
            scratch_shapes=[pltpu.VMEM((tB, D), acc_dtype)],
        ),
        compiler_params=pltpu.CompilerParams(
            dimension_semantics=("parallel", "arbitrary"),
            vmem_limit_bytes=vmem_limit,
        ),
        cost_estimate=cost,
    )(x, w, b)
    return out[0, :B]                                 # (1, pad_B) -> (B,)


# --------------------------------------------------------------------------
# Params / reference / test
# --------------------------------------------------------------------------
def init_params(key, in_features=256):
    # PyTorch nn.Linear default init: U(-k, k), k = 1/sqrt(fan_in).
    k = 1.0 / jnp.sqrt(jnp.float32(in_features))
    kw, kb = jax.random.split(key)
    w = jax.random.uniform(kw, (1, in_features), minval=-k, maxval=k,
                           dtype=jnp.float32)
    b = jax.random.uniform(kb, (1, 1), minval=-k, maxval=k, dtype=jnp.float32)
    return w, b


def discrim_ref(x, w, b):
    # Pure-JAX reference (same math as Discrim.forward), f32 throughout.
    pooled = jnp.max(x.astype(jnp.float32), axis=1)            # (B, D)
    return jnp.sum(pooled * w[0].astype(jnp.float32)[None, :],
                   axis=-1) + b[0, 0]                          # (B,)


if __name__ == "__main__":
    key = jax.random.PRNGKey(0)
    kx, kx2, kx3, kp = jax.random.split(key, 4)

    D = 256                                           # last_fc input width
    w, b = init_params(kp, in_features=D)

    # 1) Small shape from the spec (single tile).
    B, S = 2, 8
    x = jax.random.normal(kx, (B, S, D), dtype=jnp.float32)
    out = discrim_forward(x, w, b)
    jax.block_until_ready(out)
    ref = discrim_ref(x, w, b)
    assert out.shape == (B,), out.shape
    assert jnp.allclose(out, ref, atol=1e-4, rtol=1e-4)

    # 2) Multi S-tile accumulation path (small byte target forces tS < S).
    B2, S2 = 4, 64
    x2 = jax.random.normal(kx2, (B2, S2, D), dtype=jnp.float32)
    out2 = discrim_forward(x2, w, b, target_block_bytes=32 << 10)
    jax.block_until_ready(out2)
    assert jnp.allclose(out2, discrim_ref(x2, w, b), atol=1e-4, rtol=1e-4)

    # 3) Multi B-tile (parallel axis) path.
    B3, S3 = 256, 16
    x3 = jax.random.normal(kx3, (B3, S3, D), dtype=jnp.float32)
    out3 = discrim_forward(x3, w, b)
    jax.block_until_ready(out3)
    assert jnp.allclose(out3, discrim_ref(x3, w, b), atol=1e-4, rtol=1e-4)

    # 4) bf16 input path (bf16 running max on v6e/v7x, f32 on v5e).
    xb = x.astype(jnp.bfloat16)
    outb = discrim_forward(xb, w, b)
    jax.block_until_ready(outb)
    assert jnp.allclose(outb, discrim_ref(xb, w, b), atol=1e-4, rtol=1e-4)

    print("KERNEL_OK")
</pallas_src>

<mosaic_0001>
module attributes {stable_mosaic.version = 11 : i64} {
  func.func @discrim_kernel(%arg0: i32, %arg1: i32, %arg2: memref<2x8x256xf32, #tpu.memory_space<vmem>>, %arg3: memref<1x256xf32, #tpu.memory_space<vmem>>, %arg4: memref<1x1xf32, #tpu.memory_space<smem>>, %arg5: memref<1x2xf32, #tpu.memory_space<vmem>>, %arg6: memref<2x256xf32, #tpu.memory_space<vmem>>) attributes {dimension_semantics = [#tpu.dimension_semantics<parallel>, #tpu.dimension_semantics<arbitrary>], iteration_bounds = array<i64: 1, 1>, scalar_prefetch = 0 : i64, scratch_operands = 1 : i64, tpu.core_type = #tpu.core_type<tc>, window_params = [{transform_indices = @transform_0, window_bounds = array<i64: 2, 8, 256>}, {pipeline_mode = #tpu.pipeline_mode<synchronous>, transform_indices = @transform_1, window_bounds = array<i64: 1, 256>}, {transform_indices = @transform_2, window_bounds = array<i64: 1, 1>}, {transform_indices = @transform_3, window_bounds = array<i64: 1, 2>}]} {
    %c0_i32 = arith.constant 0 : i32
    %0 = arith.cmpi eq, %arg1, %c0_i32 : i32
    %1 = arith.extui %0 : i1 to i32
    %c0_i32_0 = arith.constant 0 : i32
    %2 = arith.cmpi ne, %1, %c0_i32_0 : i32
    scf.if %2 {
      %cst_9 = arith.constant 0xFF800000 : f32
      %11 = vector.broadcast %cst_9 : f32 to vector<2x256xf32>
      %c0_10 = arith.constant 0 : index
      %c0_11 = arith.constant 0 : index
      %12 = vector.load %arg6[%c0_10, %c0_11] : memref<2x256xf32, #tpu.memory_space<vmem>>, vector<2x256xf32>
      tpu.vector_store %arg6[%c0_10, %c0_11], %11 {strides = array<i32>} : memref<2x256xf32, #tpu.memory_space<vmem>>, vector<2x256xf32>,
    } else {
    }
    %c0 = arith.constant 0 : index
    %c0_1 = arith.constant 0 : index
    %c0_2 = arith.constant 0 : index
    %3 = vector.load %arg2[%c0, %c0_1, %c0_2] : memref<2x8x256xf32, #tpu.memory_space<vmem>>, vector<2x8x256xf32>
    %c0_3 = arith.constant 0 : index
    %c0_4 = arith.constant 0 : index
    %4 = vector.load %arg6[%c0_3, %c0_4] : memref<2x256xf32, #tpu.memory_space<vmem>>, vector<2x256xf32>
    %cst = arith.constant dense<0xFF800000> : vector<2x256xf32>
    %5 = vector.multi_reduction <maximumf>, %3, %cst [1] : vector<2x8x256xf32> to vector<2x256xf32>
    %6 = arith.maximumf %4, %5 : vector<2x256xf32>
    %c0_5 = arith.constant 0 : index
    %c0_6 = arith.constant 0 : index
    %7 = vector.load %arg6[%c0_5, %c0_6] : memref<2x256xf32, #tpu.memory_space<vmem>>, vector<2x256xf32>
    tpu.vector_store %arg6[%c0_5, %c0_6], %6 {strides = array<i32>} : memref<2x256xf32, #tpu.memory_space<vmem>>, vector<2x256xf32>,
    %c0_i32_7 = arith.constant 0 : i32
    %8 = arith.cmpi eq, %arg1, %c0_i32_7 : i32
    %9 = arith.extui %8 : i1 to i32
    %c0_i32_8 = arith.constant 0 : i32
    %10 = arith.cmpi ne, %9, %c0_i32_8 : i32
    scf.if %10 {
      %c0_9 = arith.constant 0 : index
      %c0_10 = arith.constant 0 : index
      %11 = vector.load %arg6[%c0_9, %c0_10] : memref<2x256xf32, #tpu.memory_space<vmem>>, vector<2x256xf32>
      %c0_11 = arith.constant 0 : index
      %c0_12 = arith.constant 0 : index
      %12 = vector.load %arg3[%c0_11, %c0_12] : memref<1x256xf32, #tpu.memory_space<vmem>>, vector<1x256xf32>
      %13 = vector.broadcast %12 : vector<1x256xf32> to vector<2x256xf32>
      %14 = arith.mulf %11, %13 : vector<2x256xf32>
      %cst_13 = arith.constant dense<0.000000e+00> : vector<2xf32>
      %15 = vector.multi_reduction <add>, %14, %cst_13 [1] : vector<2x256xf32> to vector<2xf32>
      %c0_14 = arith.constant 0 : index
      %c0_15 = arith.constant 0 : index
      %16 = memref.load %arg4[%c0_14, %c0_15] : memref<1x1xf32, #tpu.memory_space<smem>>
      %17 = vector.broadcast %16 : f32 to vector<2xf32>
      %18 = arith.addf %15, %17 : vector<2xf32>
      %19 = vector.shape_cast %18 : vector<2xf32> to vector<1x2xf32>
      %c0_16 = arith.constant 0 : index
      %c0_17 = arith.constant 0 : index
      %20 = vector.load %arg5[%c0_16, %c0_17] : memref<1x2xf32, #tpu.memory_space<vmem>>, vector<1x2xf32>
      tpu.vector_store %arg5[%c0_16, %c0_17], %19 {strides = array<i32>} : memref<1x2xf32, #tpu.memory_space<vmem>>, vector<1x2xf32>,
    } else {
    }
    return
  }
  func.func @transform_0(%arg0: i32, %arg1: i32) -> (i32, i32, i32) {
    %c0_i32 = arith.constant 0 : i32
    %c0_i32_0 = arith.constant 0 : i32
    return %arg0, %arg1, %c0_i32 : i32, i32, i32
  }
  func.func @transform_1(%arg0: i32, %arg1: i32) -> (i32, i32) {
    %c0_i32 = arith.constant 0 : i32
    %c0_i32_0 = arith.constant 0 : i32
    %c0_i32_1 = arith.constant 0 : i32
    return %c0_i32, %c0_i32_0 : i32, i32
  }
  func.func @transform_2(%arg0: i32, %arg1: i32) -> (i32, i32) {
    %c0_i32 = arith.constant 0 : i32
    %c0_i32_0 = arith.constant 0 : i32
    %c0_i32_1 = arith.constant 0 : i32
    return %c0_i32, %c0_i32_0 : i32, i32
  }
  func.func @transform_3(%arg0: i32, %arg1: i32) -> (i32, i32) {
    %c0_i32 = arith.constant 0 : i32
    %c0_i32_0 = arith.constant 0 : i32
    return %c0_i32, %arg0 : i32, i32
  }
}

</mosaic_0001>

<bundles_post_ra>
// kernel: tpu_custom_call.1
= control target key start
LH: loop header
LB: loop body
LE: loop exit
PB: predicated region body
PF: predicated region fallthrough
CT: control target
= control target key end

     0   :  { %9 = vsyncpa [#allocation5], 0  ;;  %s240_s0 = inlined_call_operand.hbm [shape: f32[2,8,256], index: 0, kind: input, shape index: {}]   ;;  %s241_s1 = inlined_call_operand.vmem [shape: f32[1,256], index: 1, kind: input, shape index: {}]   ;;  %s242_s2 = inlined_call_operand.<no memory space> [shape: f32[1,1], index: 2, kind: input, shape index: {}]   ;;  %s243_s3 = inlined_call_operand.hbm [shape: f32[1,2], index: 3, kind: output, shape index: {}]  }
   0x1   :  { %10 = vsyncpa [#allocation6], 0  ;;  %s15_s14 = sshll.u32 %s240_s0, 4  ;;  %s198_s15 = smov [#allocation4]   ;;  %s16_s14 = int_to_ptr.hbm [resolvable:$true] %s15_s14 }
   0x2   :  { %s17_s16 = sshll.u32 %s198_s15, 4  ;;  %s199_s17 = smov 256   ;;  %s18_s16 = int_to_ptr.vmem [resolvable:$true] %s17_s16 }
   0x3   :  { %s200_s18 = smov 16  }
   0x4   :  { %23 = dma.hbm_to_vmem [thread:$0]  %s16_s14, 512, %s18_s16, [#allocation5], %s199_s17, %s199_s17, %s200_s18  }
   0x5   :  { %194 = dma.done.wait [#allocation5], 512  }
   0x6   :  { %195 = vsyncadd [#allocation5], 4294966784  ;;  %v201_v0 = vmov -inf   ;;  %v37_v1 = vld [vmem:[#allocation4] sm:$0xff]  ;;  %v38_v2 = vld [vmem:[#allocation4 + $0x8] sm:$0xff]  ;;  %vm72_vm0 = vcmask 1041408   ;;  %v118_v52 = vlaneseq  ;;  %v115_v53 = vstv %s242_s2 }
   0x7   :  { %36 = vst [vmem:[#allocation2] sm:$0xf] %v201_v0  ;;  %v39_v3 = vld [vmem:[#allocation4 + $0x10] sm:$0xff]  ;;  %v40_v4 = vld [vmem:[#allocation4 + $0x18] sm:$0xff]  ;;  %v42_v5 = vrot.slane %v37_v1, 4  ;;  %v48_v6 = vrot.slane %v38_v2, 4 }
   0x8   :  { %v54_v7 = vrot.slane %v39_v3, 4  ;;  %v60_v8 = vrot.slane %v40_v4, 4  ;;  %vm80_vm1 = vcmask 1041409   ;;  %vm82_vm2 = vcmask 1043459   ;;  %v95_v35 = vld [vmem:[%s241_s1] sm:$0x3] }
   0x9   :  { %v43_v9 = vmax.f32 %v37_v1, %v42_v5  ;;  %v49_v10 = vmax.f32 %v38_v2, %v48_v6  ;;  %vm84_vm3 = vcmask 1045509   ;;  %vm86_vm4 = vcmask 1047559   ;;  %s202_s21 = smov [#allocation7]   ;;  %s131_s25 = sshll.u32 %s243_s3, 4  ;;  %s132_s25 = int_to_ptr.hbm [resolvable:$true] %s131_s25 }
   0xa   :  { %v55_v11 = vmax.f32 %v39_v3, %v54_v7  ;;  %v61_v12 = vmax.f32 %v40_v4, %v60_v8  ;;  %v98_v40 = vperm.slane %v95_v35, 1  ;;  %v97_v42 = vperm.slane %v95_v35, 0  ;;  %s129_s22 = sshll.u32 %s202_s21, 4  ;;  %s130_s22 = int_to_ptr.vmem [resolvable:$true] %s129_s22 }
   0xb   :  { %v44_v13 = vrot.slane %v43_v9, 2  ;;  %v50_v14 = vrot.slane %v49_v10, 2  ;;  %v119_v54 = vand.u32 127, %v118_v52  ;;  %vm122_vm5 = vcmask 8192  }
   0xc   :  { %v56_v15 = vrot.slane %v55_v11, 2  ;;  %v62_v16 = vrot.slane %v61_v12, 2  ;;  %v99_v43 = vrot.slane %v98_v40, 6 }
   0xd   :  { %v45_v17 = vmax.f32 %v43_v9, %v44_v13  ;;  %v51_v18 = vmax.f32 %v49_v10, %v50_v14 }
   0xe   :  { %v57_v19 = vmax.f32 %v55_v11, %v56_v15  ;;  %v63_v20 = vmax.f32 %v61_v12, %v62_v16  ;;  %v41_v36 = vld [vmem:[#allocation2] sm:$0xf]  ;;  %v100_v44 = vsel %vm72_vm0, %v97_v42, %v99_v43 }
   0xf   :  { %v46_v21 = vrot.slane %v45_v17, 1  ;;  %v52_v22 = vrot.slane %v51_v18, 1 }
  0x10   :  { %v58_v23 = vrot.slane %v57_v19, 1  ;;  %v64_v24 = vrot.slane %v63_v20, 1 }
  0x11   :  { %v53_v25 = vmax.f32 %v51_v18, %v52_v22  ;;  %v47_v26 = vmax.f32 %v45_v17, %v46_v21 }
  0x12   :  { %v59_v27 = vmax.f32 %v57_v19, %v58_v23  ;;  %v65_v28 = vmax.f32 %v63_v20, %v64_v24 }
  0x13   :  { %v70_v29 = vrot.slane %v53_v25, 6 }
  0x14   :  { %v71_v30 = vrot.slane %v65_v28, 6 }
  0x15   :  { %v73_v31 = vsel %vm72_vm0, %v47_v26, %v70_v29 }
  0x16   :  { %v74_v32 = vsel %vm72_vm0, %v59_v27, %v71_v30 }
  0x17   :  { %v79_v33 = vrot.slane %v74_v32, 7 }
  0x19   :  { %v81_v34 = vsel %vm80_vm1, %v79_v33, %v73_v31 }
  0x1a   :  { %v83_v37 = vsel %vm82_vm2, %v79_v33, %v81_v34 }
  0x1b   :  { %v85_v38 = vsel %vm84_vm3, %v79_v33, %v83_v37 }
  0x1c   :  { %v87_v39 = vsel %vm86_vm4, %v79_v33, %v85_v38 }
  0x1d   :  { %v89_v41 = vmax.f32 %v41_v36, %v87_v39 }
  0x1f   :  { %90 = vst [vmem:[#allocation2] sm:$0xf] %v89_v41 }
  0x26   :  { %v94_v45 = vld [vmem:[#allocation2] sm:$0xf] }
  0x27   :  { %v102_v46 = vmul.f32 %v100_v44, %v94_v45 }
  0x29   :  { %104 = vst [vmem:[#allocation1] ss:$4 sm:$0xff] %v102_v46 }
  0x30   :  { %v105_v47 = vld.sshfl [vmem:[#allocation1] sm:$0xff pattern:$0x73625140]  ;;  %v106_v48 = vld.sshfl [vmem:[#allocation1 + $0x8] sm:$0xff pattern:$0x73625140] }
  0x31   :  { %v109_v49 = vsel %vm72_vm0, %v105_v47, 0.0  ;;  %v110_v50 = vsel %vm72_vm0, %v106_v48, 0.0 }
  0x32   :  { %v111_v51 = vadd.f32 %v110_v50, %v109_v49 }
  0x34   :  { %112 = vadd.xlane.f32.xlu0 %v111_v51 }
  0xa7   :  { %v113_v55 = vpop.xlane.xlu0 %112 }
  0xa8   :  { %v116_v56 = vadd.f32 %v115_v53, %v113_v55 }
  0xaa   :  { %v120_v57 = vperm.slane %v116_v56, %v119_v54 }
  0xac   :  { %123 = vst.msk [vmem:[#allocation7] sm:$0x1] %vm122_vm5, %v120_v57 }
  0xad   :  { %134 = dma.vmem_to_hbm [thread:$0]  %s130_s22, 16, %s132_s25, [#allocation6]  }
  0xae   :  { %196 = dma.done.wait [#allocation6], 16  }
  0xaf   :  { %197 = vsyncadd [#allocation6], 4294967280 }
  0xb0   :  { %139 = vsyncpa [#allocation5], 1 }
  0xb1   :  { %140 = vsyncpa [#allocation6], 1 }

</bundles_post_ra>
